<compile_context>
chip_gen: v6e
topology: v6e:2x2x1
jax: 0.10.0
libtpu: 0.0.40
codegen_flags: <defaults>
</compile_context>

<pallas_src>
import functools

import jax
import jax.numpy as jnp
from jax.experimental import pallas as pl
from jax.experimental.pallas import tpu as pltpu


def _round_up(x, m):
    return ((x + m - 1) // m) * m


def _physical_vmem_bytes():
    try:
        info = pltpu.get_tpu_info()
        v = getattr(info, "vmem_capacity_bytes", None)
        if v:
            return int(v)
    except Exception:
        pass
    return 64 * 1024 * 1024  # conservative default (v7x per-TC VMEM)


def _plan(n, f_pad):
    """Pick padded N, row tile tm, and optional reduction tile tk (None = 1-D)."""
    budget = int(_physical_vmem_bytes() * 0.6)

    # ---- row-stripe path: stream A[tm, n_pad]; XW fully resident ----------
    n_pad = _round_up(n, 128)
    xw_bytes = 2 * n_pad * f_pad * 2                      # double-buffered bf16
    chosen = None
    for tm in (1024, 512, 256, 128, 64, 32, 16, 8):
        if tm > n_pad or n_pad % tm:
            continue
        need = 2 * tm * n_pad * 2 + xw_bytes + 2 * tm * f_pad * 4 + 2 * f_pad * 4
        if need <= budget:
            chosen = tm
            break
    if chosen is not None:
        tm = chosen
        # v7x megacore: make sure the "parallel" row axis has >= 2 tiles.
        while n_pad // tm < 2 and tm >= 16 and (tm // 2) % 8 == 0:
            tm //= 2
        need = 2 * tm * n_pad * 2 + xw_bytes + 2 * tm * f_pad * 4 + 2 * f_pad * 4
        return n_pad, tm, None, need

    # ---- tiled-K fallback: row stripe does not fit VMEM --------------------
    tm, tk = 512, 2048
    n_pad = _round_up(n, tk)
    xw_bytes = 2 * n_pad * f_pad * 2
    need = 2 * tm * tk * 2 + xw_bytes + 2 * tm * f_pad * 4 + 2 * f_pad * 4
    return n_pad, tm, tk, need


def _vmem_limit_bytes(need):
    cap = int(_physical_vmem_bytes() * 0.9)
    return min(cap, max(need + (8 << 20), 32 << 20))


# ---------------------------------------------------------------------------
# Kernels
# ---------------------------------------------------------------------------
def _gcn_stripe_kernel(a_ref, xw_ref, b_ref, o_ref):
    # One row stripe:  out = ReLU(A[tm, Np] @ XW[Np, Fp] + b)
    out = jnp.dot(a_ref[...], xw_ref[...], preferred_element_type=jnp.float32)
    o_ref[...] = jnp.maximum(out + b_ref[...], 0.0)


def _gcn_ktiled_kernel(a_ref, xw_ref, b_ref, o_ref, *, tk):
    # K-reduction over A tiles; XW is a resident VMEM slab, sliced in place.
    # Accumulate directly into the (resident across k) f32 output block.
    k = pl.program_id(1)
    start = pl.multiple_of(k * tk, tk)
    partial = jnp.dot(
        a_ref[...], xw_ref[pl.ds(start, tk), :],
        preferred_element_type=jnp.float32,
    )

    @pl.when(k == 0)
    def _():
        o_ref[...] = partial

    @pl.when(k != 0)
    def _():
        o_ref[...] = o_ref[...] + partial

    @pl.when(k == pl.num_programs(1) - 1)
    def _():
        o_ref[...] = jnp.maximum(o_ref[...] + b_ref[...], 0.0)


def gcn_aggregate(a_pad, xw_pad, b_pad, *, tm, tk, vmem_limit):
    """out = ReLU(a_pad @ xw_pad + b_pad).

    a_pad: [Np,Np] bf16, xw_pad: [Np,Fp] bf16, b_pad: [1,Fp] f32 -> [Np,Fp] f32.
    tk is None -> 1-D row-stripe grid; else 2-D grid with reduction axis last.
    """
    n_pad = a_pad.shape[0]
    f_pad = xw_pad.shape[1]
    out_shape = jax.ShapeDtypeStruct((n_pad, f_pad), jnp.float32)

    if tk is None:
        grid_spec = pltpu.PrefetchScalarGridSpec(
            num_scalar_prefetch=0,
            grid=(n_pad // tm,),
            in_specs=[
                pl.BlockSpec((tm, n_pad), lambda i: (i, 0)),      # A stripe (streamed)
                pl.BlockSpec((n_pad, f_pad), lambda i: (0, 0)),   # XW resident
                pl.BlockSpec((1, f_pad), lambda i: (0, 0)),       # bias resident
            ],
            out_specs=pl.BlockSpec((tm, f_pad), lambda i: (i, 0)),
        )
        kernel = _gcn_stripe_kernel
        dims = ("parallel",)
    else:
        grid_spec = pltpu.PrefetchScalarGridSpec(
            num_scalar_prefetch=0,
            grid=(n_pad // tm, n_pad // tk),
            in_specs=[
                pl.BlockSpec((tm, tk), lambda i, k: (i, k)),        # A tile (streamed)
                pl.BlockSpec((n_pad, f_pad), lambda i, k: (0, 0)),  # XW resident slab
                pl.BlockSpec((1, f_pad), lambda i, k: (0, 0)),      # bias resident
            ],
            out_specs=pl.BlockSpec((tm, f_pad), lambda i, k: (i, 0)),  # resident over k
        )
        kernel = functools.partial(_gcn_ktiled_kernel, tk=tk)
        dims = ("parallel", "arbitrary")

    return pl.pallas_call(
        kernel,
        out_shape=out_shape,
        grid_spec=grid_spec,
        compiler_params=pltpu.CompilerParams(
            dimension_semantics=dims,
            vmem_limit_bytes=vmem_limit,
        ),
    )(a_pad, xw_pad, b_pad)


# ---------------------------------------------------------------------------
# Glue: dense symmetric-normalized adjacency from edge_index (PyG gcn_norm).
# Assumes the edge list is symmetric, deduplicated and without self-loops
# (matching the test graph); duplicate edges would be double-counted.
# ---------------------------------------------------------------------------
def normalized_adjacency(edge_index, num_nodes):
    src, dst = edge_index[0], edge_index[1]
    loops = jnp.arange(num_nodes, dtype=edge_index.dtype)
    src = jnp.concatenate([src, loops])
    dst = jnp.concatenate([dst, loops])
    adj = jnp.zeros((num_nodes, num_nodes), jnp.float32).at[dst, src].add(1.0)
    deg = adj.sum(axis=1)
    dinv_sqrt = 1.0 / jnp.sqrt(deg)  # deg >= 1 because of self-loops
    return dinv_sqrt[:, None] * adj * dinv_sqrt[None, :]


# ---------------------------------------------------------------------------
# Encoder: k GCN layers, channel plan  in -> 2*out -> ... -> out
# ---------------------------------------------------------------------------
def init_encoder_params(key, in_channels, out_channels, k=2):
    assert k >= 2
    dims = [in_channels] + [2 * out_channels] * (k - 1) + [out_channels]
    params = []
    for i in range(k):
        key, kw = jax.random.split(key)
        fin, fout = dims[i], dims[i + 1]
        limit = jnp.sqrt(6.0 / (fin + fout))  # Glorot-uniform like PyG; bias zeros
        w = jax.random.uniform(kw, (fin, fout), jnp.float32, -limit, limit)
        b = jnp.zeros((1, fout), jnp.float32)
        params.append((w, b))
    return params


def encoder_forward(params, x, edge_index):
    n = x.shape[0]
    f_pad = max(_round_up(w.shape[1], 128) for w, _ in params)
    n_pad, tm, tk, need = _plan(n, f_pad)
    vmem_limit = _vmem_limit_bytes(need)

    a_hat = normalized_adjacency(edge_index, n)
    # Padding invariant: rows/cols >= n of a_pad are zero, so padded output
    # rows become ReLU(b) but can never contaminate valid rows (the A_hat
    # columns that would read them are zero).  Keep this invariant if the
    # padding scheme ever changes.
    a_pad = (
        jnp.zeros((n_pad, n_pad), jnp.bfloat16)
        .at[:n, :n].set(a_hat.astype(jnp.bfloat16))
    )

    h = jnp.pad(x, ((0, n_pad - n), (0, 0)))  # [n_pad, F] f32 node features
    for w, b in params:
        f_out = w.shape[1]
        # Tiny dense matmul -> leave to XLA, then cast to bf16 for the kernel.
        xw = h @ w                                                  # [n_pad, f_out]
        xw_pad = jnp.pad(xw, ((0, 0), (0, f_pad - f_out))).astype(jnp.bfloat16)
        b_pad = jnp.pad(b, ((0, 0), (0, f_pad - f_out)))            # [1, f_pad]
        out_pad = gcn_aggregate(
            a_pad, xw_pad, b_pad, tm=tm, tk=tk, vmem_limit=vmem_limit
        )                                                           # [n_pad, f_pad]
        h = out_pad[:, :f_out]
    return h[:n, :]


# Pure-JAX f32 reference for correctness checking.
def encoder_ref(params, x, edge_index):
    n = x.shape[0]
    a_hat = normalized_adjacency(edge_index, n)
    for w, b in params:
        x = jnp.maximum(a_hat @ (x @ w) + b, 0.0)
    return x


if __name__ == "__main__":
    key = jax.random.PRNGKey(0)

    num_nodes = 16
    in_channels = 8
    out_channels = 4
    k = 2

    # Deterministic node features.
    key, kx = jax.random.split(key)
    x = jax.random.normal(kx, (num_nodes, in_channels), jnp.float32)

    # Undirected ring graph: edges (i, i+1) in both directions -> [2, 32].
    idx = jnp.arange(num_nodes, dtype=jnp.int32)
    nxt = (idx + 1) % num_nodes
    edge_index = jnp.stack(
        [jnp.concatenate([idx, nxt]), jnp.concatenate([nxt, idx])], axis=0
    )

    params = init_encoder_params(key, in_channels, out_channels, k=k)

    out = jax.block_until_ready(encoder_forward(params, x, edge_index))
    ref = encoder_ref(params, x, edge_index)
    assert out.shape == (num_nodes, out_channels)
    # Loose tolerance: A_hat / XW fed to the MXU in bf16 (f32 accumulation).
    assert jnp.allclose(out, ref, atol=5e-2, rtol=5e-2), (
        float(jnp.max(jnp.abs(out - ref)))
    )

    # Also exercise the tiled-K reduction path (used for large graphs) at a
    # small forced tiling, against a pure-JAX reference.
    ka, kw2, kb2 = jax.random.split(key, 3)
    np_t, f_t = 256, 128
    a_t = (0.1 * jax.random.uniform(ka, (np_t, np_t), jnp.float32)).astype(jnp.bfloat16)
    xw_t = jax.random.normal(kw2, (np_t, f_t), jnp.float32).astype(jnp.bfloat16)
    b_t = 0.1 * jax.random.normal(kb2, (1, f_t), jnp.float32)
    out_t = jax.block_until_ready(
        gcn_aggregate(a_t, xw_t, b_t, tm=128, tk=128, vmem_limit=32 << 20)
    )
    ref_t = jnp.maximum(
        a_t.astype(jnp.float32) @ xw_t.astype(jnp.float32) + b_t, 0.0
    )
    assert jnp.allclose(out_t, ref_t, atol=5e-2, rtol=5e-2), (
        float(jnp.max(jnp.abs(out_t - ref_t)))
    )

    print("KERNEL_OK")
</pallas_src>

<mosaic_0001>
module attributes {stable_mosaic.version = 11 : i64} {
  func.func @_gcn_stripe_kernel(%arg0: i32, %arg1: memref<64x128xbf16, #tpu.memory_space<vmem>>, %arg2: memref<128x128xbf16, #tpu.memory_space<vmem>>, %arg3: memref<1x128xf32, #tpu.memory_space<vmem>>, %arg4: memref<64x128xf32, #tpu.memory_space<vmem>>) attributes {dimension_semantics = [#tpu.dimension_semantics<parallel>], iteration_bounds = array<i64: 2>, scalar_prefetch = 0 : i64, scratch_operands = 0 : i64, tpu.core_type = #tpu.core_type<tc>, window_params = [{transform_indices = @transform_0, window_bounds = array<i64: 64, 128>}, {pipeline_mode = #tpu.pipeline_mode<synchronous>, transform_indices = @transform_1, window_bounds = array<i64: 128, 128>}, {pipeline_mode = #tpu.pipeline_mode<synchronous>, transform_indices = @transform_2, window_bounds = array<i64: 1, 128>}, {transform_indices = @transform_3, window_bounds = array<i64: 64, 128>}]} {
    %c0 = arith.constant 0 : index
    %c0_0 = arith.constant 0 : index
    %0 = vector.load %arg1[%c0, %c0_0] : memref<64x128xbf16, #tpu.memory_space<vmem>>, vector<64x128xbf16>
    %c0_1 = arith.constant 0 : index
    %c0_2 = arith.constant 0 : index
    %1 = vector.load %arg2[%c0_1, %c0_2] : memref<128x128xbf16, #tpu.memory_space<vmem>>, vector<128x128xbf16>
    %cst = arith.constant dense<0.000000e+00> : vector<64x128xf32>
    %2 = tpu.matmul %0, %1, %cst {dimension_numbers = #tpu.dot_dimension_numbers<[1], [0], [0], [1], [0, 0, 1, 1], [], []>} : vector<64x128xbf16>, vector<128x128xbf16>, vector<64x128xf32> -> vector<64x128xf32>
    %c0_3 = arith.constant 0 : index
    %c0_4 = arith.constant 0 : index
    %3 = vector.load %arg3[%c0_3, %c0_4] : memref<1x128xf32, #tpu.memory_space<vmem>>, vector<1x128xf32>
    %4 = vector.broadcast %3 : vector<1x128xf32> to vector<64x128xf32>
    %5 = arith.addf %2, %4 : vector<64x128xf32>
    %cst_5 = arith.constant 0.000000e+00 : f32
    %6 = vector.broadcast %cst_5 : f32 to vector<64x128xf32>
    %7 = arith.maximumf %5, %6 : vector<64x128xf32>
    %c0_6 = arith.constant 0 : index
    %c0_7 = arith.constant 0 : index
    %8 = vector.load %arg4[%c0_6, %c0_7] : memref<64x128xf32, #tpu.memory_space<vmem>>, vector<64x128xf32>
    tpu.vector_store %arg4[%c0_6, %c0_7], %7 {strides = array<i32>} : memref<64x128xf32, #tpu.memory_space<vmem>>, vector<64x128xf32>,
    return
  }
  func.func @transform_0(%arg0: i32) -> (i32, i32) {
    %c0_i32 = arith.constant 0 : i32
    %c0_i32_0 = arith.constant 0 : i32
    return %arg0, %c0_i32 : i32, i32
  }
  func.func @transform_1(%arg0: i32) -> (i32, i32) {
    %c0_i32 = arith.constant 0 : i32
    %c0_i32_0 = arith.constant 0 : i32
    %c0_i32_1 = arith.constant 0 : i32
    return %c0_i32, %c0_i32_0 : i32, i32
  }
  func.func @transform_2(%arg0: i32) -> (i32, i32) {
    %c0_i32 = arith.constant 0 : i32
    %c0_i32_0 = arith.constant 0 : i32
    %c0_i32_1 = arith.constant 0 : i32
    return %c0_i32, %c0_i32_0 : i32, i32
  }
  func.func @transform_3(%arg0: i32) -> (i32, i32) {
    %c0_i32 = arith.constant 0 : i32
    %c0_i32_0 = arith.constant 0 : i32
    return %arg0, %c0_i32 : i32, i32
  }
}

</mosaic_0001>

<bundles_post_ra>
// kernel: tpu_custom_call.1
= control target key start
LH: loop header
LB: loop body
LE: loop exit
PB: predicated region body
PF: predicated region fallthrough
CT: control target
= control target key end

     0   :  { %8 = vsyncpa [#allocation3], 0  ;;  %s988_s0 = inlined_call_operand.hbm [shape: bf16[128,128], index: 0, kind: input, shape index: {}]   ;;  %s989_s1 = inlined_call_operand.hbm [shape: bf16[128,128], index: 1, kind: input, shape index: {}]   ;;  %s990_s2 = inlined_call_operand.vmem [shape: f32[1,128], index: 2, kind: input, shape index: {}]   ;;  %s991_s3 = inlined_call_operand.hbm [shape: f32[128,128], index: 3, kind: output, shape index: {}]  }
   0x1   :  { %10 = vsyncpa [#allocation3 + $0x1], 0 }
   0x2   :  { %11 = vsyncpa [#allocation6], 0 }
   0x3   :  { %12 = vsyncpa [#allocation4], 0 }
   0x4   :  { %14 = vsyncpa [#allocation4 + $0x1], 0  ;;  %s795_s12 = smov 0   ;;  %s797_s13 = smov 0  }
   0x5   :  { %s799_s14 = smov 0   ;;  %s801_s15 = smov 0  }
   0x6 LB: > { %s816_s16 = sadd.s32 4294967295, %s766_s15   ;;  %s488_s17 = sadd.s32 4294967294, %s766_s15   ;;  %s766_s15 = sphi %s801_s15, %s1013_s15   ;;  %s762_s14 = sphi %s799_s14, %s1012_s14   ;;  %s758_s13 = sphi %s797_s13, %s1011_s13   ;;  %s754_s12 = sphi %s795_s12, %s1010_s12  }
   0x7   : > { %p40_p0 = scmp.ne.s32.totalorder %s758_s13, %s754_s12  ;;  %p992_p1 = scmp.eq.s32.totalorder %s816_s16, 0 }
   0x8   : > { %p112_p3 = scmp.eq.s32.totalorder %s488_s17, 1  ;;  %p489_p5 = scmp.ge.s32.totalorder %s766_s15, 1 }
   0x9   : > { %p825_p4 = por %p992_p1, %p40_p0  ;;  %p119_p7 = scmp.lt.s32.totalorder %s766_s15, 3 }
   0xa   : > { %p830_p6 = por %p112_p3, %p40_p0  ;;  %s768_s21 = smov [#allocation5]  }
   0xb   : > { %s996_s18 = scalar_select %p825_p4, 1, 0 }
   0xc   : > { %s997_s19 = scalar_select %p830_p6, 1, 0 }
   0xd   : > { %p835_p8 = pnand %p489_p5, %p119_p7  ;;  %s131_s22 = sshll.u32 %s768_s21, 4  ;;  %s132_s22 = int_to_ptr.vmem [resolvable:$true] %s131_s22 }
   0xe   : > { %s849_s24 = sadd.s32 1, %s766_s15   ;;  %s27_s25 = sadd.s32 1, %s762_s14 }
   0xf   : > { %s998_s20 = scalar_select %p835_p8, 1, 0 }
  0x10   : > { %p579_p9 = pneg %p835_p8  ;;  %s24_s26 = ssub.s32 %s766_s15, %s849_s24 }
  0x11   : > { %s655_s27 = scalar_lea.vmem %s132_s22, 1024  ;;  %p663_p5 = scmp.lt.s32.totalorder %s132_s22, %s132_s22 }
  0x12   : > { %p844_p11 = pnand %p579_p9, %p992_p1  ;;  %p656_p13 = scmp.ne.s32.totalorder %s132_s22, %s655_s27 }
  0x13   : > { %p664_p7 = scmp.lt.s32.totalorder %s655_s27, %s655_s27 }
  0x14   : > { %p646_p12 = pneg %p844_p11 }
  0x15   : > { %p665_p10 = por %p664_p7, %p663_p5 }
  0x16   : > { %p658_p0 = pnand %p656_p13, %p646_p12 }
  0x18   : > { %p659_p3 = pneg %p658_p0 }
  0x1a   : > { %p666_p2 = pnand %p665_p10, %p659_p3 }
  0x1c   : > { %669 = shalt.err (!%p666_p2)
}
  0x1d   : > { %s769_s28 = smov 64   ;;  %s770_s29 = smov 4  }
  0x1e   : > { %582 = dma.hbm_to_vmem [thread:$0]  (!%p844_p11), %s989_s1, 1024, %s132_s22, [#allocation6], %s769_s28, %s769_s28, %s770_s29  }
  0x1f   : > { %p25_p2 = scmp.eq.s32.totalorder %s24_s26, 0  ;;  %p34_p9 = scmp.ne.s32.totalorder %s762_s14, %s758_s13 }
  0x20   : > { %p35_p10 = scmp.eq.s32.totalorder %s766_s15, 0  ;;  %p592_p12 = scmp.lt.s32.totalorder %s766_s15, 2 }
  0x21   : > { %s869_s5 = scalar_select %p25_p2, %s762_s14, %s27_s25  }
  0x22   : > { %p36_p13 = por %p35_p10, %p34_p9  ;;  %p1000_p0 = scmp.eq.s32.totalorder %s816_s16, 1 }
  0x23   : > { %s148_s7 = sand.u32 1, %s762_s14   ;;  %s517_s8 = sshll.u32 %s766_s15, 9 }
  0x24   : > { %p873_p3 = por %p1000_p0, %p34_p9  ;;  %s492_s9 = sshll.u32 %s148_s7, 5 }
  0x25   : > { %s882_s17 = scalar_lea.hbm %s988_s0, %s517_s8  ;;  %s152_s21 = scalar_lea.vmem [#allocation2], %s492_s9 }
  0x26   : > { %s1001_s6 = scalar_select %p873_p3, 1, 0 }
  0x27   : > { %s159_s22 = sshll.u32 %s152_s21, 4  ;;  %p884_p11 = pnand %p592_p12, %p36_p13  ;;  %s888_s22 = int_to_ptr.vmem [resolvable:$true] %s159_s22 }
  0x28   : > { %s890_s25 = scalar_lea.sflag [#allocation3], %s148_s7  ;;  %s670_s26 = scalar_lea.hbm %s882_s17, 512 }
  0x29   : > { %p671_p5 = scmp.ne.s32.totalorder %s882_s17, %s670_s26  ;;  %p672_p7 = pneg %p884_p11 }
  0x2a   : > { %s675_s4 = scalar_lea.hbm %s988_s0, 1024  ;;  %p676_p10 = scmp.lt.s32.totalorder %s882_s17, %s988_s0 }
  0x2b   : > { %p673_p2 = pnand %p672_p7, %p671_p5  ;;  %p677_p12 = scmp.lt.s32.totalorder %s675_s4, %s670_s26 }
  0x2d   : > { %p674_p9 = pneg %p673_p2  ;;  %p678_p13 = por %p677_p12, %p676_p10 }
  0x2f   : > { %p679_p0 = pnand %p678_p13, %p674_p9 }
  0x31   : > { %682 = shalt.err (!%p679_p0)
}
  0x32   : > { %s683_s7 = scalar_lea.vmem %s888_s22, 512  ;;  %s771_s10 = smov [#allocation2]  }
  0x33   : > { %p684_p1 = scmp.ne.s32.totalorder %s888_s22, %s683_s7  ;;  %s688_s11 = sshll.u32 %s771_s10, 4  ;;  %s689_s11 = int_to_ptr.vmem [resolvable:$false] %s688_s11 }
  0x34   : > { %s690_s21 = scalar_lea.vmem %s689_s11, 1024  ;;  %p691_p2 = scmp.lt.s32.totalorder %s888_s22, %s689_s11 }
  0x35   : > { %p686_p6 = pnand %p684_p1, %p672_p7  ;;  %p692_p3 = scmp.lt.s32.totalorder %s690_s21, %s683_s7 }
  0x37   : > { %p687_p5 = pneg %p686_p6  ;;  %p693_p4 = por %p692_p3, %p691_p2 }
  0x39   : > { %p694_p8 = pnand %p693_p4, %p687_p5 }
  0x3b   : > { %697 = shalt.err (!%p694_p8)
}
  0x3c   : > { %586 = dma.hbm_to_vmem [thread:$0]  (!%p884_p11), %s882_s17, 512, %s888_s22, %s890_s25, %s769_s28, %s769_s28, %s770_s29  }
  0x3d   : > { %p1003_p1 = scmp.ne.s32.totalorder %s998_s20, 0 }
  0x3e   : > { %s917_s26 = sand.u32 (!%p1003_p1), 1, %s758_s13   ;;  %p1004_p4 = scmp.ne.s32.totalorder (!%p1003_p1), %s996_s18, 0 }
  0x3f   : > { %171 = sbr.rel (%p1003_p1) target bundleno = 322 (0x142), region = 32  ;;  %s496_s27 = sshll.u32 (!%p1003_p1), %s917_s26, 5 }
  0x40   : > { %s174_s30 = scalar_lea.sflag (!%p1003_p1), [#allocation3], %s917_s26  ;;  %s921_s4 = scalar_lea.vmem (!%p1003_p1), [#allocation2], %s496_s27 }
  0x44   : > { %741 = dma.done.wait (%p1004_p4), %s174_s30, 512  }
  0x45   : > { %743 = vsyncadd (%p1004_p4), %s174_s30, 4294966784  ;;  %p1005_p6 = scmp.eq.s32.totalorder %s816_s16, 0 }
  0x47   : > { %745 = dma.done.wait (%p1005_p6), [#allocation6], 1024   ;;  %p1006_p8 = pmov %p1005_p6 }
  0x48   : > { %v632_v0 = vld [vmem:[#allocation5 + $0x38] sm:$0xff]   ;;  %v633_v1 = vld [vmem:[#allocation5 + $0x30] sm:$0xff]   ;;  %v634_v2 = vld [vmem:[#allocation5 + $0x28] sm:$0xff]   ;;  %s498_s28 = sshll.u32 %s917_s26, 6  ;;  %s518_s22 = sshll.u32 %s816_s16, 10 }
  0x49   : > { %747 = vsyncadd (%p1006_p8), [#allocation6], 4294966272  ;;  %531 = vmatprep.subr.bf16.mxu0 %v632_v0  ;;  %555 = vmatprep.subr.bf16.mxu1 %v632_v0  ;;  %v635_v3 = vld [vmem:[#allocation5 + $0x20] sm:$0xff]   ;;  %v641_v5 = vld [vmem:[%s921_s4 + $0x10] sm:$0xff]   ;;  %s203_s29 = scalar_lea.vmem [#allocation7], %s498_s28  ;;  %s945_s8 = scalar_lea.hbm %s991_s3, %s518_s22 }
  0x4a   : > { %532 = vmatpush3.bf16.msra.mxu0 %v632_v0  ;;  %563 = vmatpush3.bf16.msra.mxu1 %v632_v0  ;;  %v640_v4 = vld [vmem:[%s921_s4] sm:$0xff]   ;;  %v636_v6 = vld [vmem:[#allocation5 + $0x18] sm:$0xff]   ;;  %v637_v7 = vld [vmem:[#allocation5 + $0x10] sm:$0xff]   ;;  %s405_s17 = sshll.u32 %s203_s29, 4  ;;  %s392_s16 = scalar_lea.sflag [#allocation4], %s917_s26  ;;  %s940_s17 = int_to_ptr.vmem [resolvable:$true] %s405_s17 }
  0x4b   : > { %533 = vmatprep.subr.bf16.mxu0 %v633_v1  ;;  %556 = vmatprep.subr.bf16.mxu1 %v633_v1  ;;  %v638_v8 = vld [vmem:[#allocation5 + $0x8] sm:$0xff]   ;;  %v639_v9 = vld [vmem:[#allocation5] sm:$0xff]   ;;  %v643_v11 = vld [vmem:[%s921_s4 + $0x18] sm:$0xff]   ;;  %s698_s9 = scalar_lea.vmem %s940_s17, 1024  ;;  %p1007_p11 = scmp.ne.s32.totalorder %s1001_s6, 0 }
  0x4c   : > { %547 = vmatprep.mubr.bf16.mxu0 %v640_v4  ;;  %551 = vmatprep.mubr.bf16.mxu1 %v641_v5  ;;  %v642_v10 = vld [vmem:[%s921_s4 + $0x8] sm:$0xff]   ;;  %v499_v12 = vld [vmem:[%s990_s2] ss:$0 sm:$0xff]  ;;  %p699_p3 = scmp.ne.s32.totalorder %s940_s17, %s698_s9  ;;  %s772_s7 = smov [#allocation7]  }
  0x4d   : > { %s702_s10 = sshll.u32 %s772_s7, 4  ;;  %s703_s10 = int_to_ptr.vmem [resolvable:$false] %s702_s10 }
  0x4e   : > { %534 = vmatpush3.bf16.msra.mxu0 %v633_v1  ;;  %564 = vmatpush3.bf16.msra.mxu1 %v633_v1  ;;  %p700_p7 = pnand %p699_p3, %p1007_p11  ;;  %s704_s11 = scalar_lea.vmem %s703_s10, 2048 }
  0x4f   : > { %535 = vmatprep.subr.bf16.mxu0 %v634_v2  ;;  %557 = vmatprep.subr.bf16.mxu1 %v634_v2  ;;  %p705_p10 = scmp.lt.s32.totalorder %s940_s17, %s703_s10  ;;  %p706_p12 = scmp.lt.s32.totalorder %s704_s11, %s698_s9 }
  0x50   : > { %p701_p9 = pneg %p700_p7 }
  0x51   : > { %p707_p13 = por %p706_p12, %p705_p10 }
  0x52   : > { %536 = vmatpush3.bf16.msra.mxu0 %v634_v2  ;;  %565 = vmatpush3.bf16.msra.mxu1 %v634_v2 }
  0x53   : > { %537 = vmatprep.subr.bf16.mxu0 %v635_v3  ;;  %558 = vmatprep.subr.bf16.mxu1 %v635_v3  ;;  %p708_p0 = pnand %p707_p13, %p701_p9 }
  0x56   : > { %538 = vmatpush3.bf16.msra.mxu0 %v635_v3  ;;  %566 = vmatpush3.bf16.msra.mxu1 %v635_v3 }
  0x57   : > { %539 = vmatprep.subr.bf16.mxu0 %v636_v6  ;;  %559 = vmatprep.subr.bf16.mxu1 %v636_v6 }
  0x5a   : > { %540 = vmatpush3.bf16.msra.mxu0 %v636_v6  ;;  %567 = vmatpush3.bf16.msra.mxu1 %v636_v6 }
  0x5b   : > { %541 = vmatprep.subr.bf16.mxu0 %v637_v7  ;;  %560 = vmatprep.subr.bf16.mxu1 %v637_v7 }
  0x5e   : > { %542 = vmatpush3.bf16.msra.mxu0 %v637_v7  ;;  %568 = vmatpush3.bf16.msra.mxu1 %v637_v7 }
  0x5f   : > { %543 = vmatprep.subr.bf16.mxu0 %v638_v8  ;;  %561 = vmatprep.subr.bf16.mxu1 %v638_v8 }
  0x62   : > { %544 = vmatpush3.bf16.msra.mxu0 %v638_v8  ;;  %569 = vmatpush3.bf16.msra.mxu1 %v638_v8 }
  0x63   : > { %545 = vmatprep.subr.bf16.mxu0 %v639_v9  ;;  %562 = vmatprep.subr.bf16.mxu1 %v639_v9 }
  0x66   : > { %546 = vmatpush3.bf16.msra.mxu0 %v639_v9  ;;  %570 = vmatpush3.bf16.msra.mxu1 %v639_v9 }
  0x69   : > { %548 = vmatmul.mubr.bf16.vlgmr.msra.gmra.mxu0 %v642_v10  ;;  %552 = vmatmul.mubr.bf16.vlgmr.msra.gmra.mxu1 %v643_v11 }
 0x129   : > { %v549_v13 = vpop.f32.mrf.mxu0  ;;  %v553_v14 = vpop.f32.mrf.mxu1 }
 0x12a   : > { %v353_v15 = vadd.f32 %v549_v13, %v499_v12  ;;  %v369_v16 = vadd.f32 %v553_v14, %v499_v12 }
 0x12b   : > { %v344_v17 = vpop.f32.mrf.mxu0  ;;  %v360_v18 = vpop.f32.mrf.mxu1 }
 0x12c   : > { %v377_v19 = vmax.f32 %v353_v15, 0.0  ;;  %v381_v20 = vmax.f32 %v369_v16, 0.0  ;;  %v345_v21 = vadd.f32 %v499_v12, %v344_v17  ;;  %v361_v22 = vadd.f32 %v499_v12, %v360_v18 }
 0x12d   : > { %v550_v23 = vpop.f32.mrf.mxu0  ;;  %v554_v24 = vpop.f32.mrf.mxu1 }
 0x12e   : > { %385 = vst [vmem:[%s203_s29 + $0x10] sm:$0xff] %v377_v19  ;;  %389 = vst [vmem:[%s203_s29 + $0x30] sm:$0xff] %v381_v20  ;;  %v375_v25 = vmax.f32 %v345_v21, 0.0  ;;  %v379_v26 = vmax.f32 %v361_v22, 0.0  ;;  %v356_v27 = vadd.f32 %v550_v23, %v499_v12  ;;  %v372_v28 = vadd.f32 %v554_v24, %v499_v12 }
 0x12f   : > { %v347_v29 = vpop.f32.mrf.mxu0  ;;  %v363_v30 = vpop.f32.mrf.mxu1 }
 0x130   : > { %383 = vst [vmem:[%s203_s29] sm:$0xff] %v375_v25  ;;  %387 = vst [vmem:[%s203_s29 + $0x20] sm:$0xff] %v379_v26  ;;  %v378_v31 = vmax.f32 %v356_v27, 0.0  ;;  %v382_v32 = vmax.f32 %v372_v28, 0.0  ;;  %v348_v33 = vadd.f32 %v499_v12, %v347_v29  ;;  %v364_v34 = vadd.f32 %v499_v12, %v363_v30 }
 0x132   : > { %386 = vst [vmem:[%s203_s29 + $0x18] sm:$0xff] %v378_v31  ;;  %390 = vst [vmem:[%s203_s29 + $0x38] sm:$0xff] %v382_v32  ;;  %v376_v35 = vmax.f32 %v348_v33, 0.0  ;;  %v380_v36 = vmax.f32 %v364_v34, 0.0 }
 0x134   : > { %384 = vst [vmem:[%s203_s29 + $0x8] sm:$0xff] %v376_v35  ;;  %388 = vst [vmem:[%s203_s29 + $0x28] sm:$0xff] %v380_v36 }
 0x135   : > { %711 = shalt.err (!%p708_p0)
}
 0x136   : > { %s712_s21 = scalar_lea.hbm %s945_s8, 1024  ;;  %s716_s4 = scalar_lea.hbm %s991_s3, 2048 }
 0x137   : > { %p713_p5 = scmp.ne.s32.totalorder %s945_s8, %s712_s21  ;;  %p717_p4 = scmp.lt.s32.totalorder %s945_s8, %s991_s3 }
 0x138   : > { %p718_p6 = scmp.lt.s32.totalorder %s716_s4, %s712_s21 }
 0x139   : > { %p714_p2 = pnand %p713_p5, %p1007_p11 }
 0x13a   : > { %p719_p8 = por %p718_p6, %p717_p4 }
 0x13b   : > { %p715_p1 = pneg %p714_p2 }
 0x13d   : > { %p720_p3 = pnand %p719_p8, %p715_p1 }
 0x13f   : > { %723 = shalt.err (!%p720_p3)
}
 0x140   : > { %s773_s28 = smov 128   ;;  %s774_s29 = smov 8  }
 0x141   : > { %577 = dma.vmem_to_hbm [thread:$0]  (%p1007_p11), %s940_s17, 1024, %s945_s8, %s392_s16, %s773_s28, %s773_s28, %s774_s29  }
 0x142 PF: > { %s420_s22 = sand.u32 1, %s754_s12   ;;  %p1008_p7 = scmp.ne.s32.totalorder %s997_s19, 0 }
 0x143   : > { %p1009_p9 = scmp.ge.s32.totalorder %s766_s15, 2  ;;  %s421_s23 = scalar_lea.sflag [#allocation4], %s420_s22 }
 0x145   : > { %p588_p10 = pnand %p1009_p9, %p1008_p7 }
 0x147   : > { %p589_p12 = pneg %p588_p10 }
 0x149   : > { %749 = dma.done.wait (%p589_p12), %s421_s23, 1024  }
 0x14a   : > { %751 = vsyncadd (%p589_p12), %s421_s23, 4294966272  ;;  %p17_p13 = scmp.ge.s32.totalorder %s849_s24, 4   ;;  %s1010_s12 = smov %s758_s13 }
 0x14b   : > { %s1011_s13 = smov %s762_s14  ;;  %s1012_s14 = smov %s869_s5 }
 0x14c   : > { %s1013_s15 = smov %s849_s24  ;;  %19 = sbr.rel (!%p17_p13) target bundleno = 6 (0x6), region = 81 }
 0x151   :  { %426 = vsyncpa [#allocation3], 1 }
 0x152   :  { %428 = vsyncpa [#allocation3 + $0x1], 1 }
 0x153   :  { %429 = vsyncpa [#allocation6], 1 }
 0x154   :  { %430 = vsyncpa [#allocation4], 1 }
 0x155   :  { %432 = vsyncpa [#allocation4 + $0x1], 1 }

</bundles_post_ra>
